<compile_context>
chip_gen: v7x
topology: tpu7x:2x2x1
jax: 0.10.0
libtpu: 0.0.40
codegen_flags: <defaults>
</compile_context>

<pallas_src>
import numpy as np
import jax
import jax.numpy as jnp
from jax import lax
from jax.experimental import pallas as pl
from jax.experimental.pallas import tpu as pltpu


# ----------------------------------------------------------------------------
# Deterministic "config" (mirrors PropulsionManeuveringConfig fields)
# ----------------------------------------------------------------------------
CONFIG = dict(
    # added mass (AddedMass4DOFConfig)
    Xud=-50.0, Yvd=-200.0, Ypd=-10.0, Yrd=-30.0,
    Kvd=-10.0, Kpd=-100.0, Krd=-5.0,
    Nvd=-30.0, Npd=-5.0, Nrd=-300.0,
    # rigid body / hydrostatics (MinimalManeuveringConfig)
    m=1000.0, Ixx=500.0, Izz=800.0, xg=0.5, zg=-0.2,
    rho_water=1000.0, disp=1.0, gm=0.5, g=9.81,
    # propulsion (PropulsionManeuveringConfig)
    wake_factor=0.2, diameter=1.5, Kt=(0.5, -0.3, 0.1),
    lx=-2.0, ly=1.0, lz=-0.5,
)
DT = 0.1

_LANE = 128   # lane width (batch minor axis)
_SUB = 8      # sublane chunk (strip-mine granularity on the row axis)


# ----------------------------------------------------------------------------
# Deterministic parameter matrices (built once in numpy, exactly like the torch module)
# ----------------------------------------------------------------------------
def build_rigid_body_matrix_4dof(mass, inertia, cog):
    m = mass
    ixx, ixy, ixz = inertia[0]
    iyx, iyy, iyz = inertia[1]
    izx, izy, izz = inertia[2]
    xg, yg, zg = cog
    mrb6 = np.array(
        [[m, 0.0, 0.0, 0.0, m * zg, -m * yg],
         [0.0, m, 0.0, -m * zg, 0.0, m * xg],
         [0.0, 0.0, m, m * yg, -m * xg, 0.0],
         [0.0, -m * zg, m * yg, ixx, -ixy, -ixz],
         [m * zg, 0.0, -m * xg, -iyx, iyy, -iyz],
         [-m * yg, m * xg, 0.0, -izx, -izy, izz]],
        dtype=np.float64,
    )
    idx = (0, 1, 3, 5)
    return mrb6[np.ix_(idx, idx)]


def build_4dof_added_mass_matrix(cfg):
    ma = np.array(
        [[cfg["Xud"], 0.0, 0.0, 0.0],
         [0.0, cfg["Yvd"], cfg["Ypd"], cfg["Yrd"]],
         [0.0, cfg["Kvd"], cfg["Kpd"], cfg["Krd"]],
         [0.0, cfg["Nvd"], cfg["Npd"], cfg["Nrd"]]],
        dtype=np.float64,
    )
    return -ma


def build_inverse_mass(cfg):
    mass = cfg["m"]
    inertia = np.array([[cfg["Ixx"], 0.0, 0.0],
                        [0.0, 0.0, 0.0],
                        [0.0, 0.0, cfg["Izz"]]], dtype=np.float64)
    cog = np.array([cfg["xg"], 0.0, cfg["zg"]], dtype=np.float64)
    m_rb = build_rigid_body_matrix_4dof(mass, inertia, cog)
    m_a = build_4dof_added_mass_matrix(cfg)
    return np.linalg.inv(m_rb + m_a)            # inv(M), 4x4 float64


def build_reference_matrices(cfg):
    """crb^T (as stored by RigidBodyCoriolis4DOF), G, inv_mass^T -- for the pure-JAX reference."""
    m, xg, zg = cfg["m"], cfg["xg"], cfg["zg"]
    crb = np.array(
        [[0.0, -m, m * zg, -m * xg],
         [m, 0.0, 0.0, 0.0],
         [-m * zg, 0.0, 0.0, 0.0],
         [m * xg, 0.0, 0.0, 0.0]],
        dtype=np.float64,
    ).T
    G = np.zeros((4, 4), dtype=np.float64)
    G[2, 2] = cfg["rho_water"] * cfg["g"] * cfg["disp"] * cfg["gm"]
    inv_mass_t = build_inverse_mass(cfg).T
    return (jnp.asarray(crb, dtype=jnp.float32),
            jnp.asarray(G, dtype=jnp.float32),
            jnp.asarray(inv_mass_t, dtype=jnp.float32))


# ----------------------------------------------------------------------------
# Pallas kernel: fused, sublane-dense, constants baked as FMAs, strip-mined
# ----------------------------------------------------------------------------
def make_kernel(cfg, dt, inv_mass, n_chunks):
    w = float(cfg["wake_factor"])
    d = float(cfg["diameter"])
    rho = float(cfg["rho_water"])
    kt0, kt1, kt2 = (float(k) for k in cfg["Kt"])
    lx, ly, lz = float(cfg["lx"]), float(cfg["ly"]), float(cfg["lz"])
    m = float(cfg["m"])
    xg, zg = float(cfg["xg"]), float(cfg["zg"])
    k_hs = float(cfg["rho_water"] * cfg["g"] * cfg["disp"] * cfg["gm"])
    dt = float(dt)

    one_minus_w = 1.0 - w
    c2 = rho * d * d * kt0          # thrust polynomial coefficients (Kt folded in)
    c3 = rho * (d ** 3) * kt1
    c4 = rho * (d ** 4) * kt2
    im = [[float(inv_mass[i, j]) for j in range(4)] for i in range(4)]

    def kernel(x_ref, out_ref):
        # x_ref:  (8, tile_r, 128)  feature rows: 0=n_rpm 1=delta_l 2=delta_r 3=u 4=v 5=p 6=r 7=phi
        # out_ref:(5, tile_r, 128)  rows: du dv dp dr (phi + dt*dp)
        def chunk(c, carry):
            s = pl.multiple_of(c * _SUB, _SUB)
            rows = pl.ds(s, _SUB)

            # full (8, 128) vreg loads per feature -- no sublane extracts / relayouts
            n = x_ref[0, rows, :] * (1.0 / 60.0)
            dl = x_ref[1, rows, :]
            dr = x_ref[2, rows, :]
            u = x_ref[3, rows, :]
            v = x_ref[4, rows, :]
            p = x_ref[5, rows, :]
            r = x_ref[6, rows, :]
            phi = x_ref[7, rows, :]

            # symmetric rudder-propeller pair (sin/cos run on the EUP slot)
            cdl, sdl = jnp.cos(dl), jnp.sin(dl)
            cdr, sdr = jnp.cos(dr), jnp.sin(dr)
            val = jnp.maximum(one_minus_w * (cdl * u + sdl * v), 0.0)
            var = jnp.maximum(one_minus_w * (cdr * u + sdr * v), 0.0)

            nn = n * n
            tl = jnp.maximum(c2 * val * val + c3 * val * n + c4 * nn, 0.0)
            tr = jnp.maximum(c2 * var * var + c3 * var * n + c4 * nn, 0.0)

            fxl, fxr = cdl * tl, cdr * tr
            fx = fxl + fxr
            fy = sdl * tl + sdr * tr

            # tau_total = tau_propulsion - tau_coriolis - tau_hydrostatic (all baked, no matmul)
            tau0 = fx - r * (m * (zg * p - v - xg * r))
            tau1 = fy - (m * u) * r
            tau2 = (-lz) * fy + ((m * zg) * u) * r - k_hs * phi
            tau3 = lx * fy + ly * (fxl - fxr) - ((m * xg) * u) * r

            # acceleration = tau_total @ inv(M)^T  -> 16 constant-coefficient FMAs
            acc0 = im[0][0] * tau0 + im[0][1] * tau1 + im[0][2] * tau2 + im[0][3] * tau3
            acc1 = im[1][0] * tau0 + im[1][1] * tau1 + im[1][2] * tau2 + im[1][3] * tau3
            acc2 = im[2][0] * tau0 + im[2][1] * tau1 + im[2][2] * tau2 + im[2][3] * tau3
            acc3 = im[3][0] * tau0 + im[3][1] * tau1 + im[3][2] * tau2 + im[3][3] * tau3

            # full (8, 128) unmasked vreg stores
            out_ref[0, rows, :] = acc0
            out_ref[1, rows, :] = acc1
            out_ref[2, rows, :] = acc2
            out_ref[3, rows, :] = acc3
            out_ref[4, rows, :] = phi + dt * acc2
            return carry

        lax.fori_loop(0, n_chunks, chunk, 0, unroll=min(4, n_chunks))

    return kernel


# ----------------------------------------------------------------------------
# Tiling helpers
# ----------------------------------------------------------------------------
def _cdiv(a, b):
    return (a + b - 1) // b


def _round_up(a, b):
    return _cdiv(a, b) * b


def _packed_tile_r(rows, max_tile_r=256):
    """Largest multiple-of-8 divisor of `rows` <= max_tile_r; prefers >=2 grid steps."""
    cap = max(_SUB, (min(max_tile_r, rows) // _SUB) * _SUB)
    tile = _SUB
    for t in range(cap, _SUB - 1, -_SUB):
        if rows % t == 0:
            tile = t
            break
    # v7x megacore: prefer >= 2 grid steps over the row axis when there is enough work
    if rows > _SUB and rows // tile < 2:
        half = max(_SUB, _round_up(_cdiv(rows, 2), _SUB))
        for t in range(half, _SUB - 1, -_SUB):
            if rows % t == 0:
                tile = t
                break
    return tile


def _compat_tiles(batch, max_tile_r=256):
    """(rows_padded, tile_r) for a flat batch laid out as (rows, 128)."""
    rows = _round_up(_cdiv(batch, _LANE), _SUB)
    tile_r = min(max_tile_r, rows)
    # v7x megacore: aim for >= 2 grid steps when there is more than one sublane chunk
    if rows > _SUB and tile_r >= rows:
        tile_r = _cdiv(rows, 2)
    tile_r = max(_SUB, (tile_r // _SUB) * _SUB)
    return _round_up(rows, tile_r), tile_r


# ----------------------------------------------------------------------------
# Fast path: feature-major packed API (no wrapper relayouts)
# ----------------------------------------------------------------------------
def propulsion_maneuvering_forward_packed(x_packed, tile_r=None, cfg=CONFIG, dt=DT):
    """x_packed: (8, R, C) float32 with R % 8 == 0, C % 128 == 0.
    Feature rows: [rpm, delta_l, delta_r, u, v, p, r, phi]; batch element b at [:, b//C, b%C].
    Returns (5, R, C): [du, dv, dp, dr, phi + dt*dp] in the same layout."""
    nf, R, C = x_packed.shape
    assert nf == 8 and R % _SUB == 0 and C % _LANE == 0
    if tile_r is None:
        tile_r = _packed_tile_r(R)
    assert tile_r % _SUB == 0 and R % tile_r == 0

    kernel = make_kernel(cfg, dt, build_inverse_mass(cfg), tile_r // _SUB)

    return pl.pallas_call(
        kernel,
        out_shape=jax.ShapeDtypeStruct((5, R, C), jnp.float32),
        grid_spec=pltpu.PrefetchScalarGridSpec(
            num_scalar_prefetch=0,
            grid=(R // tile_r, C // _LANE),
            in_specs=[pl.BlockSpec((8, tile_r, _LANE), lambda i, j: (0, i, j))],
            out_specs=pl.BlockSpec((5, tile_r, _LANE), lambda i, j: (0, i, j)),
        ),
        compiler_params=pltpu.CompilerParams(
            dimension_semantics=("parallel", "parallel"),   # megacore sharding on v7x
            vmem_limit_bytes=32 * 1024 * 1024,              # blocks ~1.6 MiB double-buffered
        ),
    )(x_packed)


# ----------------------------------------------------------------------------
# Compatibility wrapper matching the PyTorch signature (single pack / unpack pass)
# ----------------------------------------------------------------------------
def propulsion_maneuvering_forward(control, state, cfg=CONFIG, dt=DT, max_tile_r=256):
    """control: (B,3) [rpm, delta_l, delta_r]; state: (B,5) [u,v,p,r,phi] -> (B,5)."""
    B = state.shape[0]
    rows_p, tile_r = _compat_tiles(B, max_tile_r)
    Bp = rows_p * _LANE

    x = jnp.concatenate(
        [control.astype(jnp.float32), state.astype(jnp.float32)], axis=1)   # (B, 8)
    if Bp != B:
        x = jnp.pad(x, ((0, Bp - B), (0, 0)))
    x_packed = x.T.reshape(8, rows_p, _LANE)                                 # feature-major

    out_packed = propulsion_maneuvering_forward_packed(x_packed, tile_r=tile_r, cfg=cfg, dt=dt)
    return out_packed.reshape(5, Bp).T[:B]                                   # (B, 5)


# ----------------------------------------------------------------------------
# Pure-JAX reference (mirrors the PyTorch forward exactly, matrix form)
# ----------------------------------------------------------------------------
def reference_forward(control, state, cfg=CONFIG, dt=DT):
    crb_t, G, inv_mass_t = build_reference_matrices(cfg)
    B = state.shape[0]
    velocity = state[:, :4]
    position = jnp.zeros((B, 4), dtype=state.dtype).at[:, 2].set(state[:, 4])

    r = velocity[:, 3:4]
    tau_crb = (r * velocity) @ crb_t
    tau_hs = position @ G

    w, d, rho = cfg["wake_factor"], cfg["diameter"], cfg["rho_water"]
    kt = jnp.asarray(cfg["Kt"], dtype=jnp.float32)
    lx, ly, lz = cfg["lx"], cfg["ly"], cfg["lz"]

    u, v = velocity[:, 0], velocity[:, 1]
    n = control[:, 0] / 60.0
    deltal, deltar = control[:, 1], control[:, 2]
    val = jax.nn.relu((1.0 - w) * (jnp.cos(deltal) * u + jnp.sin(deltal) * v))
    var = jax.nn.relu((1.0 - w) * (jnp.cos(deltar) * u + jnp.sin(deltar) * v))
    xl = jnp.stack([rho * d ** 2 * val * val, rho * d ** 3 * val * n, rho * d ** 4 * n * n], axis=1)
    xr = jnp.stack([rho * d ** 2 * var * var, rho * d ** 3 * var * n, rho * d ** 4 * n * n], axis=1)
    tl = jax.nn.relu(xl @ kt)
    tr = jax.nn.relu(xr @ kt)
    fxl, fxr = jnp.cos(deltal) * tl, jnp.cos(deltar) * tr
    fyl, fyr = jnp.sin(deltal) * tl, jnp.sin(deltar) * tr
    tau_prop = jnp.stack(
        [fxl + fxr, fyl + fyr, lz * (-fyl - fyr), lx * (fyl + fyr) + ly * (fxl - fxr)], axis=1)

    tau_total = tau_prop - tau_crb - tau_hs
    acc = tau_total @ inv_mass_t
    return jnp.concatenate([acc, (position[:, 2] + dt * acc[:, 2])[:, None]], axis=1)


# ----------------------------------------------------------------------------
# Test driver
# ----------------------------------------------------------------------------
def _make_inputs(key, batch):
    k1, k2, k3 = jax.random.split(key, 3)
    rpm = 60.0 + 60.0 * jax.random.uniform(k1, (batch, 1), dtype=jnp.float32)
    deltas = 0.3 * jax.random.normal(k2, (batch, 2), dtype=jnp.float32)
    control = jnp.concatenate([rpm, deltas], axis=1)
    state = jax.random.normal(k3, (batch, 5), dtype=jnp.float32) * jnp.asarray(
        [3.0, 1.0, 0.1, 0.2, 0.05], dtype=jnp.float32)
    return control, state


if __name__ == "__main__":
    key = jax.random.PRNGKey(0)
    ka, kb = jax.random.split(key)

    ok = True
    for k, batch in ((ka, 8), (kb, 4096)):     # tiny case + multi-grid-step case
        control, state = _make_inputs(k, batch)
        out = jax.block_until_ready(propulsion_maneuvering_forward(control, state))
        ref = reference_forward(control, state)
        assert out.shape == (batch, 5) and out.dtype == jnp.float32
        ok = ok and bool(jnp.allclose(out, ref, rtol=1e-4, atol=1e-3))

    assert ok, "kernel output does not match reference"
    print("KERNEL_OK")
</pallas_src>

<mosaic_0001>
module attributes {stable_mosaic.version = 11 : i64} {
  func.func @kernel(%arg0: i32, %arg1: i32, %arg2: memref<8x8x128xf32, #tpu.memory_space<vmem>>, %arg3: memref<5x8x128xf32, #tpu.memory_space<vmem>>) attributes {dimension_semantics = [#tpu.dimension_semantics<parallel>, #tpu.dimension_semantics<parallel>], iteration_bounds = array<i64: 1, 1>, scalar_prefetch = 0 : i64, scratch_operands = 0 : i64, tpu.core_type = #tpu.core_type<tc>, window_params = [{transform_indices = @transform_0, window_bounds = array<i64: 8, 8, 128>}, {transform_indices = @transform_1, window_bounds = array<i64: 5, 8, 128>}]} {
    %c0_i32 = arith.constant 0 : i32
    %c8_i32 = arith.constant 8 : i32
    %0 = arith.muli %c0_i32, %c8_i32 : i32
    %1 = tpu.assume_multiple %0, 8 : i32
    %c0 = arith.constant 0 : index
    %2 = arith.index_cast %1 : i32 to index
    %c0_0 = arith.constant 0 : index
    %3 = vector.load %arg2[%c0, %2, %c0_0] : memref<8x8x128xf32, #tpu.memory_space<vmem>>, vector<1x8x128xf32>
    %4 = vector.shape_cast %3 : vector<1x8x128xf32> to vector<8x128xf32>
    %cst = arith.constant 0.0166666675 : f32
    %5 = vector.broadcast %cst : f32 to vector<8x128xf32>
    %6 = arith.mulf %4, %5 : vector<8x128xf32>
    %c1 = arith.constant 1 : index
    %7 = arith.index_cast %1 : i32 to index
    %c0_1 = arith.constant 0 : index
    %8 = vector.load %arg2[%c1, %7, %c0_1] : memref<8x8x128xf32, #tpu.memory_space<vmem>>, vector<1x8x128xf32>
    %9 = vector.shape_cast %8 : vector<1x8x128xf32> to vector<8x128xf32>
    %c2 = arith.constant 2 : index
    %10 = arith.index_cast %1 : i32 to index
    %c0_2 = arith.constant 0 : index
    %11 = vector.load %arg2[%c2, %10, %c0_2] : memref<8x8x128xf32, #tpu.memory_space<vmem>>, vector<1x8x128xf32>
    %12 = vector.shape_cast %11 : vector<1x8x128xf32> to vector<8x128xf32>
    %c3 = arith.constant 3 : index
    %13 = arith.index_cast %1 : i32 to index
    %c0_3 = arith.constant 0 : index
    %14 = vector.load %arg2[%c3, %13, %c0_3] : memref<8x8x128xf32, #tpu.memory_space<vmem>>, vector<1x8x128xf32>
    %15 = vector.shape_cast %14 : vector<1x8x128xf32> to vector<8x128xf32>
    %c4 = arith.constant 4 : index
    %16 = arith.index_cast %1 : i32 to index
    %c0_4 = arith.constant 0 : index
    %17 = vector.load %arg2[%c4, %16, %c0_4] : memref<8x8x128xf32, #tpu.memory_space<vmem>>, vector<1x8x128xf32>
    %18 = vector.shape_cast %17 : vector<1x8x128xf32> to vector<8x128xf32>
    %c5 = arith.constant 5 : index
    %19 = arith.index_cast %1 : i32 to index
    %c0_5 = arith.constant 0 : index
    %20 = vector.load %arg2[%c5, %19, %c0_5] : memref<8x8x128xf32, #tpu.memory_space<vmem>>, vector<1x8x128xf32>
    %21 = vector.shape_cast %20 : vector<1x8x128xf32> to vector<8x128xf32>
    %c6 = arith.constant 6 : index
    %22 = arith.index_cast %1 : i32 to index
    %c0_6 = arith.constant 0 : index
    %23 = vector.load %arg2[%c6, %22, %c0_6] : memref<8x8x128xf32, #tpu.memory_space<vmem>>, vector<1x8x128xf32>
    %24 = vector.shape_cast %23 : vector<1x8x128xf32> to vector<8x128xf32>
    %c7 = arith.constant 7 : index
    %25 = arith.index_cast %1 : i32 to index
    %c0_7 = arith.constant 0 : index
    %26 = vector.load %arg2[%c7, %25, %c0_7] : memref<8x8x128xf32, #tpu.memory_space<vmem>>, vector<1x8x128xf32>
    %27 = vector.shape_cast %26 : vector<1x8x128xf32> to vector<8x128xf32>
    %28 = math.cos %9 : vector<8x128xf32>
    %29 = math.sin %9 : vector<8x128xf32>
    %30 = math.cos %12 : vector<8x128xf32>
    %31 = math.sin %12 : vector<8x128xf32>
    %32 = arith.mulf %28, %15 : vector<8x128xf32>
    %33 = arith.mulf %29, %18 : vector<8x128xf32>
    %34 = arith.addf %32, %33 : vector<8x128xf32>
    %cst_8 = arith.constant 8.000000e-01 : f32
    %35 = vector.broadcast %cst_8 : f32 to vector<8x128xf32>
    %36 = arith.mulf %35, %34 : vector<8x128xf32>
    %cst_9 = arith.constant 0.000000e+00 : f32
    %37 = vector.broadcast %cst_9 : f32 to vector<8x128xf32>
    %38 = arith.maximumf %36, %37 : vector<8x128xf32>
    %39 = arith.mulf %30, %15 : vector<8x128xf32>
    %40 = arith.mulf %31, %18 : vector<8x128xf32>
    %41 = arith.addf %39, %40 : vector<8x128xf32>
    %cst_10 = arith.constant 8.000000e-01 : f32
    %42 = vector.broadcast %cst_10 : f32 to vector<8x128xf32>
    %43 = arith.mulf %42, %41 : vector<8x128xf32>
    %cst_11 = arith.constant 0.000000e+00 : f32
    %44 = vector.broadcast %cst_11 : f32 to vector<8x128xf32>
    %45 = arith.maximumf %43, %44 : vector<8x128xf32>
    %46 = arith.mulf %6, %6 : vector<8x128xf32>
    %cst_12 = arith.constant 1.125000e+03 : f32
    %47 = vector.broadcast %cst_12 : f32 to vector<8x128xf32>
    %48 = arith.mulf %47, %38 : vector<8x128xf32>
    %49 = arith.mulf %48, %38 : vector<8x128xf32>
    %cst_13 = arith.constant -1.012500e+03 : f32
    %50 = vector.broadcast %cst_13 : f32 to vector<8x128xf32>
    %51 = arith.mulf %50, %38 : vector<8x128xf32>
    %52 = arith.mulf %51, %6 : vector<8x128xf32>
    %53 = arith.addf %49, %52 : vector<8x128xf32>
    %cst_14 = arith.constant 5.062500e+02 : f32
    %54 = vector.broadcast %cst_14 : f32 to vector<8x128xf32>
    %55 = arith.mulf %54, %46 : vector<8x128xf32>
    %56 = arith.addf %53, %55 : vector<8x128xf32>
    %cst_15 = arith.constant 0.000000e+00 : f32
    %57 = vector.broadcast %cst_15 : f32 to vector<8x128xf32>
    %58 = arith.maximumf %56, %57 : vector<8x128xf32>
    %cst_16 = arith.constant 1.125000e+03 : f32
    %59 = vector.broadcast %cst_16 : f32 to vector<8x128xf32>
    %60 = arith.mulf %59, %45 : vector<8x128xf32>
    %61 = arith.mulf %60, %45 : vector<8x128xf32>
    %cst_17 = arith.constant -1.012500e+03 : f32
    %62 = vector.broadcast %cst_17 : f32 to vector<8x128xf32>
    %63 = arith.mulf %62, %45 : vector<8x128xf32>
    %64 = arith.mulf %63, %6 : vector<8x128xf32>
    %65 = arith.addf %61, %64 : vector<8x128xf32>
    %cst_18 = arith.constant 5.062500e+02 : f32
    %66 = vector.broadcast %cst_18 : f32 to vector<8x128xf32>
    %67 = arith.mulf %66, %46 : vector<8x128xf32>
    %68 = arith.addf %65, %67 : vector<8x128xf32>
    %cst_19 = arith.constant 0.000000e+00 : f32
    %69 = vector.broadcast %cst_19 : f32 to vector<8x128xf32>
    %70 = arith.maximumf %68, %69 : vector<8x128xf32>
    %71 = arith.mulf %28, %58 : vector<8x128xf32>
    %72 = arith.mulf %30, %70 : vector<8x128xf32>
    %73 = arith.addf %71, %72 : vector<8x128xf32>
    %74 = arith.mulf %29, %58 : vector<8x128xf32>
    %75 = arith.mulf %31, %70 : vector<8x128xf32>
    %76 = arith.addf %74, %75 : vector<8x128xf32>
    %cst_20 = arith.constant -2.000000e-01 : f32
    %77 = vector.broadcast %cst_20 : f32 to vector<8x128xf32>
    %78 = arith.mulf %77, %21 : vector<8x128xf32>
    %79 = arith.subf %78, %18 : vector<8x128xf32>
    %cst_21 = arith.constant 5.000000e-01 : f32
    %80 = vector.broadcast %cst_21 : f32 to vector<8x128xf32>
    %81 = arith.mulf %80, %24 : vector<8x128xf32>
    %82 = arith.subf %79, %81 : vector<8x128xf32>
    %cst_22 = arith.constant 1.000000e+03 : f32
    %83 = vector.broadcast %cst_22 : f32 to vector<8x128xf32>
    %84 = arith.mulf %83, %82 : vector<8x128xf32>
    %85 = arith.mulf %24, %84 : vector<8x128xf32>
    %86 = arith.subf %73, %85 : vector<8x128xf32>
    %cst_23 = arith.constant 1.000000e+03 : f32
    %87 = vector.broadcast %cst_23 : f32 to vector<8x128xf32>
    %88 = arith.mulf %87, %15 : vector<8x128xf32>
    %89 = arith.mulf %88, %24 : vector<8x128xf32>
    %90 = arith.subf %76, %89 : vector<8x128xf32>
    %cst_24 = arith.constant 5.000000e-01 : f32
    %91 = vector.broadcast %cst_24 : f32 to vector<8x128xf32>
    %92 = arith.mulf %91, %76 : vector<8x128xf32>
    %cst_25 = arith.constant -2.000000e+02 : f32
    %93 = vector.broadcast %cst_25 : f32 to vector<8x128xf32>
    %94 = arith.mulf %93, %15 : vector<8x128xf32>
    %95 = arith.mulf %94, %24 : vector<8x128xf32>
    %96 = arith.addf %92, %95 : vector<8x128xf32>
    %cst_26 = arith.constant 4.905000e+03 : f32
    %97 = vector.broadcast %cst_26 : f32 to vector<8x128xf32>
    %98 = arith.mulf %97, %27 : vector<8x128xf32>
    %99 = arith.subf %96, %98 : vector<8x128xf32>
    %cst_27 = arith.constant -2.000000e+00 : f32
    %100 = vector.broadcast %cst_27 : f32 to vector<8x128xf32>
    %101 = arith.mulf %100, %76 : vector<8x128xf32>
    %102 = arith.subf %71, %72 : vector<8x128xf32>
    %cst_28 = arith.constant 1.000000e+00 : f32
    %103 = vector.broadcast %cst_28 : f32 to vector<8x128xf32>
    %104 = arith.mulf %103, %102 : vector<8x128xf32>
    %105 = arith.addf %101, %104 : vector<8x128xf32>
    %cst_29 = arith.constant 5.000000e+02 : f32
    %106 = vector.broadcast %cst_29 : f32 to vector<8x128xf32>
    %107 = arith.mulf %106, %15 : vector<8x128xf32>
    %108 = arith.mulf %107, %24 : vector<8x128xf32>
    %109 = arith.subf %105, %108 : vector<8x128xf32>
    %cst_30 = arith.constant 9.52380942E-4 : f32
    %110 = vector.broadcast %cst_30 : f32 to vector<8x128xf32>
    %111 = arith.mulf %110, %86 : vector<8x128xf32>
    %cst_31 = arith.constant 0.000000e+00 : f32
    %112 = vector.broadcast %cst_31 : f32 to vector<8x128xf32>
    %113 = arith.mulf %112, %90 : vector<8x128xf32>
    %114 = arith.addf %111, %113 : vector<8x128xf32>
    %cst_32 = arith.constant 0.000000e+00 : f32
    %115 = vector.broadcast %cst_32 : f32 to vector<8x128xf32>
    %116 = arith.mulf %115, %99 : vector<8x128xf32>
    %117 = arith.addf %114, %116 : vector<8x128xf32>
    %cst_33 = arith.constant 0.000000e+00 : f32
    %118 = vector.broadcast %cst_33 : f32 to vector<8x128xf32>
    %119 = arith.mulf %118, %109 : vector<8x128xf32>
    %120 = arith.addf %117, %119 : vector<8x128xf32>
    %cst_34 = arith.constant 0.000000e+00 : f32
    %121 = vector.broadcast %cst_34 : f32 to vector<8x128xf32>
    %122 = arith.mulf %121, %86 : vector<8x128xf32>
    %cst_35 = arith.constant 0.00114572432 : f32
    %123 = vector.broadcast %cst_35 : f32 to vector<8x128xf32>
    %124 = arith.mulf %123, %90 : vector<8x128xf32>
    %125 = arith.addf %122, %124 : vector<8x128xf32>
    %cst_36 = arith.constant -3.96418269E-4 : f32
    %126 = vector.broadcast %cst_36 : f32 to vector<8x128xf32>
    %127 = arith.mulf %126, %99 : vector<8x128xf32>
    %128 = arith.addf %125, %127 : vector<8x128xf32>
    %cst_37 = arith.constant -5.5022887E-4 : f32
    %129 = vector.broadcast %cst_37 : f32 to vector<8x128xf32>
    %130 = arith.mulf %129, %109 : vector<8x128xf32>
    %131 = arith.addf %128, %130 : vector<8x128xf32>
    %cst_38 = arith.constant 0.000000e+00 : f32
    %132 = vector.broadcast %cst_38 : f32 to vector<8x128xf32>
    %133 = arith.mulf %132, %86 : vector<8x128xf32>
    %cst_39 = arith.constant -3.96418269E-4 : f32
    %134 = vector.broadcast %cst_39 : f32 to vector<8x128xf32>
    %135 = arith.mulf %134, %90 : vector<8x128xf32>
    %136 = arith.addf %133, %135 : vector<8x128xf32>
    %cst_40 = arith.constant 0.00180388975 : f32
    %137 = vector.broadcast %cst_40 : f32 to vector<8x128xf32>
    %138 = arith.mulf %137, %99 : vector<8x128xf32>
    %139 = arith.addf %136, %138 : vector<8x128xf32>
    %cst_41 = arith.constant 1.82802032E-4 : f32
    %140 = vector.broadcast %cst_41 : f32 to vector<8x128xf32>
    %141 = arith.mulf %140, %109 : vector<8x128xf32>
    %142 = arith.addf %139, %141 : vector<8x128xf32>
    %cst_42 = arith.constant 0.000000e+00 : f32
    %143 = vector.broadcast %cst_42 : f32 to vector<8x128xf32>
    %144 = arith.mulf %143, %86 : vector<8x128xf32>
    %cst_43 = arith.constant -5.5022887E-4 : f32
    %145 = vector.broadcast %cst_43 : f32 to vector<8x128xf32>
    %146 = arith.mulf %145, %90 : vector<8x128xf32>
    %147 = arith.addf %144, %146 : vector<8x128xf32>
    %cst_44 = arith.constant 1.82802032E-4 : f32
    %148 = vector.broadcast %cst_44 : f32 to vector<8x128xf32>
    %149 = arith.mulf %148, %99 : vector<8x128xf32>
    %150 = arith.addf %147, %149 : vector<8x128xf32>
    %cst_45 = arith.constant 0.00117337028 : f32
    %151 = vector.broadcast %cst_45 : f32 to vector<8x128xf32>
    %152 = arith.mulf %151, %109 : vector<8x128xf32>
    %153 = arith.addf %150, %152 : vector<8x128xf32>
    %c0_46 = arith.constant 0 : index
    %154 = arith.index_cast %1 : i32 to index
    %c0_47 = arith.constant 0 : index
    %155 = vector.load %arg3[%c0_46, %154, %c0_47] : memref<5x8x128xf32, #tpu.memory_space<vmem>>, vector<1x8x128xf32>
    %156 = vector.shape_cast %155 : vector<1x8x128xf32> to vector<8x128xf32>
    %157 = vector.shape_cast %120 : vector<8x128xf32> to vector<1x8x128xf32>
    tpu.vector_store %arg3[%c0_46, %154, %c0_47], %157 {strides = array<i32>} : memref<5x8x128xf32, #tpu.memory_space<vmem>>, vector<1x8x128xf32>,
    %c1_48 = arith.constant 1 : index
    %158 = arith.index_cast %1 : i32 to index
    %c0_49 = arith.constant 0 : index
    %159 = vector.load %arg3[%c1_48, %158, %c0_49] : memref<5x8x128xf32, #tpu.memory_space<vmem>>, vector<1x8x128xf32>
    %160 = vector.shape_cast %159 : vector<1x8x128xf32> to vector<8x128xf32>
    %161 = vector.shape_cast %131 : vector<8x128xf32> to vector<1x8x128xf32>
    tpu.vector_store %arg3[%c1_48, %158, %c0_49], %161 {strides = array<i32>} : memref<5x8x128xf32, #tpu.memory_space<vmem>>, vector<1x8x128xf32>,
    %c2_50 = arith.constant 2 : index
    %162 = arith.index_cast %1 : i32 to index
    %c0_51 = arith.constant 0 : index
    %163 = vector.load %arg3[%c2_50, %162, %c0_51] : memref<5x8x128xf32, #tpu.memory_space<vmem>>, vector<1x8x128xf32>
    %164 = vector.shape_cast %163 : vector<1x8x128xf32> to vector<8x128xf32>
    %165 = vector.shape_cast %142 : vector<8x128xf32> to vector<1x8x128xf32>
    tpu.vector_store %arg3[%c2_50, %162, %c0_51], %165 {strides = array<i32>} : memref<5x8x128xf32, #tpu.memory_space<vmem>>, vector<1x8x128xf32>,
    %c3_52 = arith.constant 3 : index
    %166 = arith.index_cast %1 : i32 to index
    %c0_53 = arith.constant 0 : index
    %167 = vector.load %arg3[%c3_52, %166, %c0_53] : memref<5x8x128xf32, #tpu.memory_space<vmem>>, vector<1x8x128xf32>
    %168 = vector.shape_cast %167 : vector<1x8x128xf32> to vector<8x128xf32>
    %169 = vector.shape_cast %153 : vector<8x128xf32> to vector<1x8x128xf32>
    tpu.vector_store %arg3[%c3_52, %166, %c0_53], %169 {strides = array<i32>} : memref<5x8x128xf32, #tpu.memory_space<vmem>>, vector<1x8x128xf32>,
    %cst_54 = arith.constant 1.000000e-01 : f32
    %170 = vector.broadcast %cst_54 : f32 to vector<8x128xf32>
    %171 = arith.mulf %170, %142 : vector<8x128xf32>
    %172 = arith.addf %27, %171 : vector<8x128xf32>
    %c4_55 = arith.constant 4 : index
    %173 = arith.index_cast %1 : i32 to index
    %c0_56 = arith.constant 0 : index
    %174 = vector.load %arg3[%c4_55, %173, %c0_56] : memref<5x8x128xf32, #tpu.memory_space<vmem>>, vector<1x8x128xf32>
    %175 = vector.shape_cast %174 : vector<1x8x128xf32> to vector<8x128xf32>
    %176 = vector.shape_cast %172 : vector<8x128xf32> to vector<1x8x128xf32>
    tpu.vector_store %arg3[%c4_55, %173, %c0_56], %176 {strides = array<i32>} : memref<5x8x128xf32, #tpu.memory_space<vmem>>, vector<1x8x128xf32>,
    %c1_i32 = arith.constant 1 : i32
    return
  }
  func.func @transform_0(%arg0: i32, %arg1: i32) -> (i32, i32, i32) {
    %c0_i32 = arith.constant 0 : i32
    %c0_i32_0 = arith.constant 0 : i32
    return %c0_i32, %arg0, %arg1 : i32, i32, i32
  }
  func.func @transform_1(%arg0: i32, %arg1: i32) -> (i32, i32, i32) {
    %c0_i32 = arith.constant 0 : i32
    %c0_i32_0 = arith.constant 0 : i32
    return %c0_i32, %arg0, %arg1 : i32, i32, i32
  }
}

</mosaic_0001>

<bundles_post_ra>
// kernel: tpu_custom_call.1
= control target key start
LH: loop header
LB: loop body
LE: loop exit
PB: predicated region body
PF: predicated region fallthrough
CT: control target
= control target key end

     0   :  { %6 = vsyncpa [#allocation3], 0  ;;  %s796_s0 = inlined_call_operand.hbm [shape: f32[8,8,128], index: 0, kind: input, shape index: {}]   ;;  %s797_s1 = inlined_call_operand.hbm [shape: f32[5,8,128], index: 1, kind: output, shape index: {}]  }
   0x1   :  { %7 = vsyncpa [#allocation4], 0  ;;  %s669_s6 = smov [#allocation2]   ;;  %s621_s10 = scalar_lea.hbm %s796_s0, 1024 }
   0x2   :  { %s13_s7 = sshll.u32 %s669_s6, 4  ;;  %p622_p0 = scmp.ne.s32.totalorder %s796_s0, %s621_s10  ;;  %s14_s7 = int_to_ptr.vmem [resolvable:$true] %s13_s7 }
   0x3   :  { %p625_p1 = scmp.lt.u32.totalorder %s621_s10, %s796_s0 }
   0x5   :  { %p627_p2 = pnand %p625_p1, %p622_p0 }
   0x7   :  { %630 = shalt.err (!%p627_p2)
}
   0x8   :  { %s631_s15 = scalar_lea.vmem %s14_s7, 1024  ;;  %p636_p4 = scmp.lt.s32.totalorder %s14_s7, %s14_s7 }
   0x9   :  { %p632_p3 = scmp.ne.s32.totalorder %s14_s7, %s631_s15  ;;  %p637_p5 = scmp.lt.s32.totalorder %s631_s15, %s631_s15 }
   0xb   :  { %p638_p6 = por %p637_p5, %p636_p4 }
   0xd   :  { %p639_p7 = pnand %p638_p6, %p632_p3 }
   0xf   :  { %642 = shalt.err (!%p639_p7)
}
  0x10   :  { %s670_s16 = smov 128   ;;  %s671_s17 = smov 8  }
  0x11   :  { %19 = dma.hbm_to_vmem [thread:$0]  %s796_s0, 1024, %s14_s7, [#allocation3], %s670_s16, %s670_s16, %s671_s17  }
  0x12   :  { %665 = dma.done.wait [#allocation3], 1024  }
  0x13   :  { %666 = vsyncadd [#allocation3], 4294966272  ;;  %v704_v0 = vld [vmem:[#allocation2 + $0x8] sm:$0xff]  ;;  %v706_v1 = vld [vmem:[#allocation2 + $0x10] sm:$0xff]  ;;  %v672_v24 = vmov 683565275  }
  0x14   :  { %v46_v2 = vand.u32 2147483647, %v704_v0  ;;  %v49_v3 = vand.u32 2139095040, %v704_v0  ;;  %v253_v4 = vand.u32 2147483647, %v706_v1  ;;  %v256_v5 = vand.u32 2139095040, %v706_v1 }
  0x15   :  { %v673_v26 = vmov 2475754826   ;;  %v674_v28 = vmov 2131351028   ;;  %v675_v30 = vmov 2102212464  }
  0x16   :  { %v50_v6 = vshrl.u32 %v49_v3, 23  ;;  %v53_v7 = vand.u32 8388607, %v46_v2  ;;  %v257_v8 = vshrl.u32 %v256_v5, 23  ;;  %v260_v9 = vand.u32 8388607, %v253_v4 }
  0x17   :  { %v676_v32 = vmov 920167782   ;;  %v677_v40 = vmov 1326507024   ;;  %vm48_vm14 = vcmp.lt.s32.totalorder %v704_v0, 0  ;;  %s678_s0 = smov [#allocation5]  }
  0x18   :  { %v579_v10 = vadd.s32 4294967169, %v50_v6  ;;  %v587_v11 = vadd.s32 4294967169, %v257_v8  ;;  %v54_v13 = vor.u32 8388608, %v53_v7  ;;  %v261_v14 = vor.u32 8388608, %v260_v9  ;;  %s556_s20 = sshll.u32 %s678_s0, 4  ;;  %s557_s20 = int_to_ptr.vmem [resolvable:$true] %s556_s20 }
  0x19   :  { %vm47_vm15 = vcmp.le.f32.partialorder %v46_v2, 0.7853982  ;;  %s643_s21 = scalar_lea.vmem %s557_s20, 640  ;;  %p648_p9 = scmp.lt.s32.totalorder %s557_s20, %s557_s20 }
  0x1a   :  { %v56_v12 = vadd.s32 1, %v579_v10  ;;  %v263_v15 = vadd.s32 1, %v587_v11  ;;  %v716_v20 = vshll.u32 %v54_v13, 8  ;;  %v718_v22 = vshll.u32 %v261_v14, 8  ;;  %p644_p8 = scmp.ne.s32.totalorder %s557_s20, %s643_s21  ;;  %p649_p10 = scmp.lt.s32.totalorder %s643_s21, %s643_s21 }
  0x1c   :  { %vm57_vm0 = vcmp.gt.s32.totalorder %v56_v12, 0  ;;  %vm264_vm1 = vcmp.gt.s32.totalorder %v263_v15, 0  ;;  %p650_p11 = por %p649_p10, %p648_p9 }
  0x1d   :  { %v58_v16 = vsel %vm57_vm0, %v56_v12, 0  ;;  %v265_v19 = vsel %vm264_vm1, %v263_v15, 0  ;;  %vm255_vm0 = vcmp.lt.s32.totalorder %v706_v1, 0  ;;  %vm254_vm1 = vcmp.le.f32.partialorder %v253_v4, 0.7853982 }
  0x1e   :  { %v59_v17 = vshrl.u32 %v58_v16, 5  ;;  %v60_v18 = vand.u32 31, %v58_v16  ;;  %v267_v21 = vand.u32 31, %v265_v19  ;;  %v720_v34 = vshrl.u32 %v265_v19, 5  ;;  %p651_p12 = pnand %p650_p11, %p644_p8 }
  0x20   :  { %v61_v23 = vsub.s32 32, %v60_v18  ;;  %v63_v25 = vshll.u32 %v672_v24, %v60_v18  ;;  %v66_v27 = vshll.u32 %v673_v26, %v60_v18  ;;  %v69_v29 = vshll.u32 %v674_v28, %v60_v18 }
  0x21   :  { %v72_v31 = vshll.u32 %v675_v30, %v60_v18  ;;  %v75_v33 = vshll.u32 %v676_v32, %v60_v18  ;;  %vm78_vm2 = vcmp.lt.s32.totalorder %v59_v17, 1  ;;  %vm79_vm3 = vcmp.lt.s32.totalorder %v59_v17, 2 }
  0x22   :  { %v62_v35 = vshrl.u32 %v672_v24, %v61_v23  ;;  %v64_v36 = vshrl.u32 %v673_v26, %v61_v23  ;;  %v67_v37 = vshrl.u32 %v674_v28, %v61_v23  ;;  %v70_v38 = vshrl.u32 %v675_v30, %v61_v23 }
  0x23   :  { %v73_v39 = vshrl.u32 %v676_v32, %v61_v23  ;;  %v76_v41 = vshrl.u32 %v677_v40, %v61_v23  ;;  %vm81_vm4 = vcmp.lt.s32.totalorder %v59_v17, 4  ;;  %v268_v45 = vsub.s32 32, %v267_v21 }
  0x24   :  { %v65_v42 = vor.u32 %v64_v36, %v63_v25  ;;  %v68_v43 = vor.u32 %v67_v37, %v66_v27  ;;  %v71_v44 = vor.u32 %v70_v38, %v69_v29  ;;  %vm80_vm5 = vcmp.lt.s32.totalorder %v59_v17, 3 }
  0x25   :  { %v74_v46 = vor.u32 %v73_v39, %v72_v31  ;;  %v77_v47 = vor.u32 %v76_v41, %v75_v33  ;;  %v270_v48 = vshll.u32 %v672_v24, %v267_v21  ;;  %v273_v56 = vshll.u32 %v673_v26, %v267_v21 }
  0x26   :  { %v82_v49 = vsel %vm78_vm2, %v62_v35, %v65_v42  ;;  %v83_v50 = vsel %vm81_vm4, %v71_v44, 2102212464  ;;  %v86_v51 = vsel %vm78_vm2, %v65_v42, %v68_v43  ;;  %v90_v52 = vsel %vm78_vm2, %v68_v43, %v71_v44 }
  0x27   :  { %v84_v53 = vsel %vm80_vm5, %v68_v43, %v83_v50  ;;  %v87_v54 = vsel %vm81_vm4, %v74_v46, 920167782  ;;  %v91_v55 = vsel %vm81_vm4, %v77_v47, 1326507024  ;;  %v269_v59 = vshrl.u32 %v672_v24, %v268_v45 }
  0x28   :  { %v88_v57 = vsel %vm80_vm5, %v71_v44, %v87_v54  ;;  %v92_v58 = vsel %vm80_vm5, %v74_v46, %v91_v55  ;;  %v271_v60 = vshrl.u32 %v673_v26, %v268_v45  ;;  %v85_v61 = vsel %vm79_vm3, %v82_v49, %v84_v53 }
  0x29   :  { %v89_v62 = vsel %vm79_vm3, %v86_v51, %v88_v57  ;;  %v93_v63 = vsel %vm79_vm3, %v90_v52, %v92_v58  ;;  %v274_v3 = vshrl.u32 %v674_v28, %v268_v45  ;;  %v276_v11 = vshll.u32 %v674_v28, %v267_v21 }
  0x2a   :  { %v729_v5 = vmul.u32.u64.low %v716_v20, %v93_v63  ;;  %v730_v6 = vmul.u32.u64.high %v716_v20, %v93_v63, %v729_v5  ;;  %v733_v7 = vmul.u32.u64.low %v716_v20, %v89_v62  ;;  %v734_v8 = vmul.u32.u64.high %v716_v20, %v89_v62, %v733_v7 }
  0x2b   :  { %v272_v9 = vor.u32 %v271_v60, %v270_v48  ;;  %v275_v10 = vor.u32 %v274_v3, %v273_v56  ;;  %v277_v12 = vshrl.u32 %v675_v30, %v268_v45  ;;  %v279_v13 = vshll.u32 %v675_v30, %v267_v21 }
  0x2c   :  { %v280_v14 = vshrl.u32 %v676_v32, %v268_v45  ;;  %v282_v15 = vshll.u32 %v676_v32, %v267_v21  ;;  %v283_v16 = vshrl.u32 %v677_v40, %v268_v45  ;;  %v101_v17 = vmul.u32 %v716_v20, %v85_v61 }
  0x2d   :  { %v278_v18 = vor.u32 %v277_v12, %v276_v11  ;;  %vm285_vm6 = vcmp.lt.s32.totalorder %v720_v34, 1  ;;  %vm286_vm7 = vcmp.lt.s32.totalorder %v720_v34, 2  ;;  %vm103_vm8 = vc.u32 %v730_v6, %v733_v7 }
  0x2e   :  { %v104_v19 = vadd.s32 1, %v734_v8  ;;  %v281_v23 = vor.u32 %v280_v14, %v279_v13  ;;  %vm287_vm9 = vcmp.lt.s32.totalorder %v720_v34, 3  ;;  %v284_v24 = vor.u32 %v283_v16, %v282_v15 }
  0x2f   :  { %vm288_vm10 = vcmp.lt.s32.totalorder %v720_v34, 4  ;;  %v289_v25 = vsel %vm285_vm6, %v269_v59, %v272_v9  ;;  %v293_v21 = vsel %vm285_vm6, %v272_v9, %v275_v10  ;;  %v297_v28 = vsel %vm285_vm6, %v275_v10, %v278_v18 }
  0x30   :  { %v105_v26 = vsel %vm103_vm8, %v104_v19, %v734_v8  ;;  %v290_v20 = vsel %vm288_vm10, %v278_v18, 2102212464  ;;  %v294_v27 = vsel %vm288_vm10, %v281_v23, 920167782  ;;  %v298_v32 = vsel %vm288_vm10, %v284_v24, 1326507024 }
  0x31   :  { %v106_v29 = vadd.s32 %v105_v26, %v101_v17  ;;  %v291_v30 = vsel %vm287_vm9, %v275_v10, %v290_v20  ;;  %v295_v31 = vsel %vm287_vm9, %v278_v18, %v294_v27  ;;  %v299_v36 = vsel %vm287_vm9, %v281_v23, %v298_v32 }
  0x32   :  { %v292_v33 = vsel %vm286_vm7, %v289_v25, %v291_v30  ;;  %v296_v35 = vsel %vm286_vm7, %v293_v21, %v295_v31  ;;  %v300_v38 = vsel %vm286_vm7, %v297_v28, %v299_v36  ;;  %v102_v57 = vadd.s32 %v733_v7, %v730_v6 }
  0x33   :  { %v107_v37 = vadd.s32 536870912, %v106_v29  ;;  %v751_v39 = vmul.u32.u64.low %v718_v22, %v296_v35  ;;  %v752_v40 = vmul.u32.u64.high %v718_v22, %v296_v35, %v751_v39  ;;  %v308_v44 = vmul.u32 %v718_v22, %v292_v33 }
  0x34   :  { %v755_v41 = vmul.u32.u64.low %v718_v22, %v300_v38  ;;  %v756_v42 = vmul.u32.u64.high %v718_v22, %v300_v38, %v755_v41  ;;  %vm138_vm8 = vweird.f32 %v704_v0 }
  0x35   :  { %v108_v43 = vshrl.u32 %v107_v37, 30  ;;  %v311_v46 = vadd.s32 1, %v752_v40 }
  0x36   :  { %vm310_vm11 = vc.u32 %v756_v42, %v751_v39  ;;  %v309_v13 = vadd.s32 %v751_v39, %v756_v42 }
  0x37   :  { %v109_v45 = vshll.u32 %v108_v43, 30  ;;  %v312_v34 = vsel %vm310_vm11, %v311_v46, %v752_v40  ;;  %v132_v6 = vsub.s32 4, %v108_v43 }
  0x38   :  { %v313_v48 = vadd.s32 %v312_v34, %v308_v44  ;;  %v773_v34 = vld [vmem:[#allocation2 + $0x18] sm:$0xff] }
  0x39   :  { %v110_v47 = vsub.s32 %v106_v29, %v109_v45  ;;  %v133_v25 = vsel %vm48_vm14, %v132_v6, %v108_v43 }
  0x3a   :  { %v314_v50 = vadd.s32 536870912, %v313_v48  ;;  %v135_v28 = vsel %vm47_vm15, 0, %v133_v25 }
  0x3b   :  { %v112_v49 = vsub.s32 0, %v110_v47  ;;  %v242_v33 = vadd.s32 3, %v135_v28  ;;  %v139_v37 = vand.u32 3, %v135_v28 }
  0x3c   :  { %v315_v52 = vshrl.u32 %v314_v50, 30 }
  0x3d   :  { %v580_v51 = vmin.u32 %v112_v49, %v110_v47  ;;  %v243_v38 = vand.u32 3, %v242_v33  ;;  %vm144_vm2 = vcmp.eq.s32.totalorder %v139_v37, 2  ;;  %vm141_vm4 = vcmp.eq.s32.totalorder %v139_v37, 0 }
  0x3e   :  { %v316_v54 = vshll.u32 %v315_v52, 30  ;;  %v339_v32 = vsub.s32 4, %v315_v52  ;;  %vm140_vm6 = vcmp.lt.s32.totalorder %v139_v37, 2 }
  0x3f   :  { %v114_v53 = vclz %v580_v51  ;;  %vm248_vm3 = vcmp.eq.s32.totalorder %v243_v38, 2  ;;  %vm245_vm5 = vcmp.eq.s32.totalorder %v243_v38, 0  ;;  %vm244_vm7 = vcmp.lt.s32.totalorder %v243_v38, 2 }
  0x40   :  { %v317_v56 = vsub.s32 %v313_v48, %v316_v54  ;;  %v340_v36 = vsel %vm255_vm0, %v339_v32, %v315_v52  ;;  %v36_v48 = vld [vmem:[#allocation2 + $0x20] sm:$0xff] }
  0x41   :  { %v581_v55 = vadd.s32 4294967294, %v114_v53  ;;  %v342_v41 = vsel %vm254_vm1, 0, %v340_v36 }
  0x42   :  { %v319_v58 = vsub.s32 0, %v317_v56  ;;  %v449_v45 = vadd.s32 3, %v342_v41  ;;  %v346_v53 = vand.u32 3, %v342_v41  ;;  %v499_v41 = vmul.f32 1000.0, %v773_v34 }
  0x43   :  { %vm582_vm12 = vcmp.lt.s32.totalorder %v581_v55, 0 }
  0x44   :  { %v117_v22 = vsel %vm582_vm12, 0, %v581_v55  ;;  %v588_v62 = vmin.u32 %v319_v58, %v317_v56  ;;  %v450_v54 = vand.u32 3, %v449_v45  ;;  %vm351_vm9 = vcmp.eq.s32.totalorder %v346_v53, 2 }
  0x45   :  { %v118_v59 = vsub.s32 32, %v117_v22  ;;  %v119_v60 = vshll.u32 %v110_v47, %v117_v22  ;;  %v122_v61 = vsub.s32 4294967266, %v117_v22  ;;  %vm348_vm11 = vcmp.eq.s32.totalorder %v346_v53, 0 }
  0x46   :  { %v321_v5 = vclz %v588_v62  ;;  %vm455_vm10 = vcmp.eq.s32.totalorder %v450_v54, 2  ;;  %vm452_vm12 = vcmp.eq.s32.totalorder %v450_v54, 0  ;;  %v503_v45 = vmul.f32 -200.0, %v773_v34 }
  0x47   :  { %v120_v63 = vshrl.u32 %v102_v57, %v118_v59  ;;  %v123_v3 = vadd.s32 127, %v122_v61  ;;  %v23_v59 = vld [vmem:[#allocation2] sm:$0xff] }
  0x48   :  { %v589_v10 = vadd.s32 4294967294, %v321_v5 }
  0x49   :  { %v121_v8 = vor.u32 %v120_v63, %v119_v60  ;;  %v124_v9 = vshll.u32 %v123_v3, 23  ;;  %v24_v3 = vmul.f32 0.016666668, %v23_v59 }
  0x4a   :  { %vm590_vm13 = vcmp.lt.s32.totalorder %v589_v10, 0 }
  0x4b   :  { %v125_v11 = vor.u32 4788187, %v124_v9  ;;  %v128_v12 = vcvt.s32.f32 %v121_v8  ;;  %v324_v7 = vsel %vm590_vm13, 0, %v589_v10  ;;  %vm347_vm13 = vcmp.lt.s32.totalorder %v346_v53, 2 }
  0x4c   :  { %v325_v15 = vsub.s32 32, %v324_v7  ;;  %v326_v16 = vshll.u32 %v317_v56, %v324_v7  ;;  %v329_v17 = vsub.s32 4294967266, %v324_v7 }
  0x4d   :  { %v126_v14 = vand.u32 2147483647, %v125_v11 }
  0x4e   :  { %v327_v19 = vshrl.u32 %v309_v13, %v325_v15  ;;  %v330_v23 = vadd.s32 127, %v329_v17 }
  0x4f   :  { %v129_v18 = vmul.f32 %v128_v12, %v126_v14  ;;  %v39_v14 = vld [vmem:[#allocation2 + $0x28] sm:$0xff] }
  0x50   :  { %v328_v21 = vor.u32 %v327_v19, %v326_v16  ;;  %v331_v26 = vshll.u32 %v330_v23, 23  ;;  %v470_v19 = vmul.f32 %v24_v3, %v24_v3 }
  0x51   :  { %v130_v24 = vxor.u32 2147483648, %v129_v18 }
  0x52   :  { %v332_v29 = vor.u32 4788187, %v331_v26  ;;  %v335_v30 = vcvt.s32.f32 %v328_v21  ;;  %v42_v21 = vld [vmem:[#allocation2 + $0x30] sm:$0xff] }
  0x53   :  { %v131_v20 = vsel %vm48_vm14, %v130_v24, %v129_v18  ;;  %vm451_vm14 = vcmp.lt.s32.totalorder %v450_v54, 2  ;;  %v504_v53 = vmul.f32 %v503_v45, %v42_v21 }
  0x54   :  { %v134_v27 = vsel %vm47_vm15, %v704_v0, %v131_v20  ;;  %v333_v31 = vand.u32 2147483647, %v332_v29  ;;  %vm345_vm15 = vweird.f32 %v706_v1 }
  0x55   :  { %613 = vcosq.f32 %v134_v27 }
  0x56   :  { %615 = vsinq.f32 %v134_v27  ;;  %v336_v35 = vmul.f32 %v335_v30, %v333_v31  ;;  %v476_v27 = vmul.f32 506.25, %v470_v19  ;;  %v494_v30 = vmul.f32 0.5, %v42_v21 }
  0x58   :  { %v337_v2 = vxor.u32 2147483648, %v336_v35 }
  0x5a   :  { %v338_v39 = vsel %vm255_vm0, %v337_v2, %v336_v35 }
  0x5b   :  { %v341_v40 = vsel %vm254_vm1, %v706_v1, %v338_v39  ;;  %v492_v1 = vmul.f32 -0.2, %v39_v14 }
  0x5c   :  { %617 = vcosq.f32 %v341_v40 }
  0x5d   :  { %619 = vsinq.f32 %v341_v40  ;;  %v493_v29 = vsub.f32 %v492_v1, %v36_v48 }
  0x5f   :  { %v614_v42 = vpop.eup %613  ;;  %v495_v36 = vsub.f32 %v493_v29, %v494_v30 }
  0x60   :  { %v616_v43 = vpop.eup %615  ;;  %v145_v44 = vxor.u32 2147483648, %v614_v42 }
  0x61   :  { %v142_v4 = vxor.u32 2147483648, %v616_v43  ;;  %v496_v40 = vmul.f32 1000.0, %v495_v36 }
  0x62   :  { %v146_v46 = vsel %vm144_vm2, %v145_v44, %v616_v43  ;;  %v250_v47 = vsel %vm248_vm3, %v145_v44, %v616_v43 }
  0x63   :  { %v143_v49 = vsel %vm141_vm4, %v614_v42, %v142_v4  ;;  %v247_v50 = vsel %vm245_vm5, %v614_v42, %v142_v4  ;;  %v511_v4 = vmul.f32 500.0, %v773_v34 }
  0x64   :  { %v147_v51 = vsel %vm140_vm6, %v143_v49, %v146_v46  ;;  %v251_v52 = vsel %vm244_vm7, %v247_v50, %v250_v47  ;;  %v45_v46 = vld [vmem:[#allocation2 + $0x38] sm:$0xff]  ;;  %v497_v49 = vmul.f32 %v496_v40, %v42_v21  ;;  %v500_v50 = vmul.f32 %v499_v41, %v42_v21 }
  0x65   :  { %v148_v55 = vsel %vm138_vm8, nan, %v147_v51  ;;  %v252_v56 = vsel %vm138_vm8, nan, %v251_v52 }
  0x66   :  { %v460_v57 = vmul.f32 %v148_v55, %v773_v34  ;;  %v461_v22 = vmul.f32 %v252_v56, %v36_v48  ;;  %v618_v58 = vpop.eup %617 }
  0x67   :  { %v620_v60 = vpop.eup %619  ;;  %v352_v61 = vxor.u32 2147483648, %v618_v58 }
  0x68   :  { %v462_v0 = vadd.f32 %v461_v22, %v460_v57  ;;  %v349_v62 = vxor.u32 2147483648, %v620_v60  ;;  %v506_v57 = vmul.f32 4905.0, %v45_v46  ;;  %v512_v22 = vmul.f32 %v511_v4, %v42_v21 }
  0x69   :  { %v353_v5 = vsel %vm351_vm9, %v352_v61, %v620_v60  ;;  %v457_v8 = vsel %vm455_vm10, %v352_v61, %v620_v60 }
  0x6a   :  { %v463_v63 = vmul.f32 0.8, %v462_v0  ;;  %v350_v9 = vsel %vm348_vm11, %v618_v58, %v349_v62  ;;  %v454_v10 = vsel %vm452_vm12, %v618_v58, %v349_v62 }
  0x6b   :  { %v354_v12 = vsel %vm347_vm13, %v350_v9, %v353_v5  ;;  %v458_v13 = vsel %vm451_vm14, %v454_v10, %v457_v8 }
  0x6c   :  { %v464_v11 = vmax.f32 %v463_v63, 0.0  ;;  %v355_v6 = vsel %vm345_vm15, nan, %v354_v12  ;;  %v459_v7 = vsel %vm345_vm15, nan, %v458_v13 }
  0x6d   :  { %v465_v17 = vmul.f32 %v355_v6, %v773_v34  ;;  %v466_v18 = vmul.f32 %v459_v7, %v36_v48 }
  0x6e   :  { %v471_v15 = vmul.f32 1125.0, %v464_v11  ;;  %v473_v16 = vmul.f32 -1012.5, %v464_v11 }
  0x6f   :  { %v467_v25 = vadd.f32 %v466_v18, %v465_v17 }
  0x70   :  { %v472_v23 = vmul.f32 %v471_v15, %v464_v11  ;;  %v474_v24 = vmul.f32 %v473_v16, %v24_v3 }
  0x71   :  { %v468_v26 = vmul.f32 0.8, %v467_v25 }
  0x72   :  { %v475_v20 = vadd.f32 %v474_v24, %v472_v23 }
  0x73   :  { %v469_v28 = vmax.f32 %v468_v26, 0.0 }
  0x74   :  { %v477_v31 = vadd.f32 %v476_v27, %v475_v20 }
  0x75   :  { %v479_v32 = vmul.f32 1125.0, %v469_v28  ;;  %v481_v33 = vmul.f32 -1012.5, %v469_v28 }
  0x76   :  { %v478_v37 = vmax.f32 %v477_v31, 0.0 }
  0x77   :  { %v480_v35 = vmul.f32 %v479_v32, %v469_v28  ;;  %v482_v2 = vmul.f32 %v481_v33, %v24_v3 }
  0x78   :  { %v486_v43 = vmul.f32 %v478_v37, %v148_v55  ;;  %v489_v44 = vmul.f32 %v478_v37, %v252_v56 }
  0x79   :  { %v483_v38 = vadd.f32 %v482_v2, %v480_v35 }
  0x7b   :  { %v484_v39 = vadd.f32 %v483_v38, %v476_v27 }
  0x7d   :  { %v485_v42 = vmax.f32 %v484_v39, 0.0 }
  0x7f   :  { %v487_v47 = vmul.f32 %v485_v42, %v355_v6  ;;  %v490_v48 = vmul.f32 %v485_v42, %v459_v7 }
  0x81   :  { %v488_v51 = vadd.f32 %v487_v47, %v486_v43  ;;  %v491_v52 = vadd.f32 %v490_v48, %v489_v44  ;;  %v509_v54 = vsub.f32 %v486_v43, %v487_v47 }
  0x83   :  { %v498_v58 = vsub.f32 %v488_v51, %v497_v49  ;;  %v501_v59 = vsub.f32 %v491_v52, %v500_v50  ;;  %v502_v0 = vmul.f32 0.5, %v491_v52  ;;  %v508_v55 = vmul.f32 -2.0, %v491_v52 }
  0x85   :  { %v505_v56 = vadd.f32 %v504_v53, %v502_v0  ;;  %v510_v60 = vadd.f32 %v509_v54, %v508_v55  ;;  %v514_v61 = vmul.f32 0.00095238094, %v498_v58  ;;  %v515_v62 = vmul.f32 0.0, %v501_v59 }
  0x86   :  { %v521_v34 = vmul.f32 0.0, %v498_v58  ;;  %v522_v63 = vmul.f32 0.0011457243, %v501_v59  ;;  %v528_v3 = vmul.f32 -0.00039641827, %v501_v59 }
  0x87   :  { %v507_v5 = vsub.f32 %v505_v56, %v506_v57  ;;  %v513_v8 = vsub.f32 %v510_v60, %v512_v22  ;;  %v516_v9 = vadd.f32 %v515_v62, %v514_v61  ;;  %v534_v10 = vmul.f32 -0.00055022887, %v501_v59 }
  0x88   :  { %v523_v11 = vadd.f32 %v522_v63, %v521_v34  ;;  %v529_v12 = vadd.f32 %v528_v3, %v521_v34 }
  0x89   :  { %v517_v13 = vmul.f32 0.0, %v507_v5  ;;  %v519_v14 = vmul.f32 0.0, %v513_v8  ;;  %v524_v6 = vmul.f32 -0.00039641827, %v507_v5  ;;  %v526_v7 = vmul.f32 -0.00055022887, %v513_v8 }
  0x8a   :  { %v530_v15 = vmul.f32 0.0018038898, %v507_v5  ;;  %v532_v16 = vmul.f32 0.00018280203, %v513_v8  ;;  %v535_v17 = vadd.f32 %v534_v10, %v521_v34  ;;  %v536_v18 = vmul.f32 0.00018280203, %v507_v5 }
  0x8b   :  { %v518_v19 = vadd.f32 %v517_v13, %v516_v9  ;;  %v525_v23 = vadd.f32 %v524_v6, %v523_v11  ;;  %v538_v24 = vmul.f32 0.0011733703, %v513_v8 }
  0x8c   :  { %v531_v25 = vadd.f32 %v530_v15, %v529_v12  ;;  %v537_v1 = vadd.f32 %v536_v18, %v535_v17 }
  0x8d   :  { %v520_v21 = vadd.f32 %v519_v14, %v518_v19  ;;  %v527_v26 = vadd.f32 %v526_v7, %v525_v23 }
  0x8e   :  { %v533_v20 = vadd.f32 %v532_v16, %v531_v25  ;;  %v539_v27 = vadd.f32 %v538_v24, %v537_v1 }
  0x8f   :  { %540 = vst [vmem:[#allocation5] sm:$0xff] %v520_v21  ;;  %542 = vst [vmem:[#allocation5 + $0x8] sm:$0xff] %v527_v26 }
  0x90   :  { %544 = vst [vmem:[#allocation5 + $0x10] sm:$0xff] %v533_v20  ;;  %546 = vst [vmem:[#allocation5 + $0x18] sm:$0xff] %v539_v27  ;;  %v547_v28 = vmul.f32 0.1, %v533_v20 }
  0x92   :  { %v548_v29 = vadd.f32 %v547_v28, %v45_v46 }
  0x94   :  { %550 = vst [vmem:[#allocation5 + $0x20] sm:$0xff] %v548_v29 }
  0x95   :  { %654 = shalt.err (!%p651_p12)
}
  0x96   :  { %s655_s24 = scalar_lea.hbm %s797_s1, 640 }
  0x97   :  { %p656_p13 = scmp.ne.s32.totalorder %s797_s1, %s655_s24  ;;  %p659_p0 = scmp.lt.u32.totalorder %s655_s24, %s797_s1 }
  0x99   :  { %p661_p1 = pnand %p659_p0, %p656_p13 }
  0x9b   :  { %664 = shalt.err (!%p661_p1)
}
  0x9c   :  { %562 = dma.vmem_to_hbm [thread:$0]  %s557_s20, 640, %s797_s1, [#allocation4], %s670_s16, %s670_s16, %s671_s17  }
  0x9d   :  { %667 = dma.done.wait [#allocation4], 640  }
  0x9e   :  { %668 = vsyncadd [#allocation4], 4294966656 }
  0x9f   :  { %566 = vsyncpa [#allocation3], 1 }
  0xa0   :  { %567 = vsyncpa [#allocation4], 1 }

</bundles_post_ra>
